<compile_context>
chip_gen: v7x
topology: tpu7x:2x2x1
jax: 0.10.0
libtpu: 0.0.40
codegen_flags: <defaults>
</compile_context>

<pallas_src>
import jax
import jax.numpy as jnp
from jax import lax
from jax.experimental import pallas as pl
from jax.experimental.pallas import tpu as pltpu


# ---------------------------------------------------------------------------
# Kernel
# ---------------------------------------------------------------------------
def _patch_dropout_gather_kernel(sel_ref, x_ref, out_ref, onehot_ref):
    """One-hot MXU gather.

    sel_ref    : VMEM (b_blk, out_len, 1) int32 -- source row in [0, N)
    x_ref      : VMEM (b_blk, N, d_chunk)       -- input sequence tile
    out_ref    : VMEM (b_blk, out_len, d_chunk) -- gathered output tile
    onehot_ref : VMEM (b_blk, out_len, N) scratch (x.dtype) -- built once per
                 batch block (d == 0) and reused for all D chunks.
    """
    @pl.when(pl.program_id(1) == 0)
    def _build_onehot():
        b_blk, out_len, seq_len = onehot_ref.shape
        col_ids = lax.broadcasted_iota(jnp.int32, (b_blk, out_len, seq_len), 2)
        # Exact 0/1 values, so the matmul below is a row gather.
        onehot_ref[...] = (col_ids == sel_ref[...]).astype(onehot_ref.dtype)

    # TODO(synk): 0*Inf / 0*NaN contributions from dropped rows can poison the
    # matmul-gather; a manual async-copy row gather would be immune if exact
    # gather semantics under non-finite activations are required.
    out_ref[...] = jnp.einsum(
        "bqk,bkd->bqd", onehot_ref[...], x_ref[...],
        preferred_element_type=jnp.float32,
    ).astype(out_ref.dtype)


# ---------------------------------------------------------------------------
# Tiling / VMEM planning
# ---------------------------------------------------------------------------
def _round_up(v, m):
    return ((v + m - 1) // m) * m


def _vmem_capacity_bytes():
    """Physical VMEM per TensorCore (v5e/v6e: 128 MiB, v7x: 64 MiB)."""
    try:
        cap = int(pltpu.get_tpu_info().vmem_capacity_bytes)
        if cap > 0:
            return cap
    except Exception:
        pass
    return 64 * 1024 * 1024   # conservative fallback (v7x-sized)


def _step_vmem_bytes(b_blk, seq_len, out_len, d_chunk, itemsize):
    """VMEM needed for one grid step: double-buffered x/out tiles, one-hot
    scratch, f32 MXU result (pre-cast), lane-padded int32 selection buffers,
    the iota/compare transient and compiler-scratch headroom."""
    x_tiles   = 2 * b_blk * seq_len * d_chunk * itemsize          # input, 2 bufs
    out_tiles = 2 * b_blk * out_len * d_chunk * itemsize          # output, 2 bufs
    onehot    = b_blk * out_len * _round_up(seq_len, 128) * itemsize
    acc_f32   = b_blk * out_len * d_chunk * 4                     # pre-cast result
    sel_tiles = 2 * b_blk * _round_up(out_len, 8) * 128 * 4       # (out_len,1) i32 pads
    iota_i32  = b_blk * out_len * _round_up(seq_len, 128) * 4     # transient at d == 0
    headroom  = 2 << 20                                           # Mosaic internal scratch
    return x_tiles + out_tiles + onehot + acc_f32 + sel_tiles + iota_i32 + headroom


def _choose_tiling(B, seq_len, out_len, D, itemsize, budget):
    """Pick (b_blk, d_chunk) so one double-buffered grid step fits the budget."""
    def fits(b, c):
        return _step_vmem_bytes(b, seq_len, out_len, c, itemsize) <= budget

    # --- D chunking (with a single batch element per step) ---
    d_chunk = D
    if D % 128 == 0 and not fits(1, D):
        divisors = [c for c in range(128, D, 128) if D % c == 0]   # ascending
        if divisors:
            # Byte floor: keep >= ~2 KiB contiguous per row when chunking so
            # HBM DMA efficiency does not collapse.
            floor = _round_up(max(1, 2048 // itemsize), 128)
            allowed = [c for c in divisors if c >= floor] or [divisors[-1]]
            fitting = [c for c in allowed if fits(1, c)]
            d_chunk = max(fitting) if fitting else min(allowed)

    # --- batch blocking (full-D small tiles only; amortizes per-step cost) ---
    b_blk = 1
    if d_chunk == D:
        for cand in range(min(B, 8), 1, -1):
            if B % cand == 0 and fits(cand, D):
                b_blk = cand
                break
    return b_blk, d_chunk


# ---------------------------------------------------------------------------
# Pallas wrapper
# ---------------------------------------------------------------------------
def patch_dropout_gather(x, keep_indices, num_prefix_tokens):
    """Pallas gather: prefix tokens + kept patch tokens, concatenated."""
    B, N, D = x.shape
    num_keep = keep_indices.shape[1]
    out_len = num_prefix_tokens + num_keep

    # Fold prefix handling into the selection indices: output row r reads
    # sequence row sel[r] (prefix rows select themselves, patch rows select
    # keep_indices + num_prefix).
    prefix_sel = jnp.broadcast_to(
        jnp.arange(num_prefix_tokens, dtype=jnp.int32)[None, :],
        (B, num_prefix_tokens))
    sel = jnp.concatenate(
        [prefix_sel, keep_indices.astype(jnp.int32) + num_prefix_tokens],
        axis=1)[..., None]                               # (B, out_len, 1)

    itemsize = x.dtype.itemsize
    vmem_cap = _vmem_capacity_bytes()
    # v5e/v6e (128 MiB) -> ~96 MiB tile budget; v7x (64 MiB) -> ~32 MiB.
    budget = min(vmem_cap - (32 << 20), (3 * vmem_cap) // 4)
    b_blk, d_chunk = _choose_tiling(B, N, out_len, D, itemsize, budget)
    n_dc = D // d_chunk

    needed = _step_vmem_bytes(b_blk, N, out_len, d_chunk, itemsize)
    vmem_limit = int(min(vmem_cap, max(needed + (8 << 20), 32 << 20)))

    return pl.pallas_call(
        _patch_dropout_gather_kernel,
        grid=(B // b_blk, n_dc),
        in_specs=[
            pl.BlockSpec((b_blk, out_len, 1), lambda b, d: (b, 0, 0)),
            pl.BlockSpec((b_blk, N, d_chunk), lambda b, d: (b, 0, d)),
        ],
        out_specs=pl.BlockSpec((b_blk, out_len, d_chunk), lambda b, d: (b, 0, d)),
        out_shape=jax.ShapeDtypeStruct((B, out_len, D), x.dtype),
        scratch_shapes=[pltpu.VMEM((b_blk, out_len, N), x.dtype)],
        compiler_params=pltpu.CompilerParams(
            # D axis carries the one-hot scratch across chunks -> "arbitrary".
            dimension_semantics=("parallel", "arbitrary"),
            vmem_limit_bytes=vmem_limit,
        ),
    )(sel, x)


def patch_dropout(x, key, *, prob=0.5, num_prefix_tokens=1, ordered=False,
                  return_indices=False, training=True):
    """JAX/Pallas equivalent of timm PatchDropout.forward."""
    assert 0.0 <= prob < 1.0
    if (not training) or prob == 0.0:
        if return_indices:
            return x, None
        return x

    B, N, D = x.shape
    L = N - num_prefix_tokens
    num_keep = max(1, int(L * (1.0 - prob)))

    # Random keep indices: argsort of gaussian noise (plain-JAX glue).
    noise = jax.random.normal(key, (B, L))
    keep_indices = jnp.argsort(noise, axis=-1)[:, :num_keep]
    if ordered:
        keep_indices = jnp.sort(keep_indices, axis=-1)
    keep_indices = keep_indices.astype(jnp.int32)

    out = patch_dropout_gather(x, keep_indices, num_prefix_tokens)

    if return_indices:
        return out, keep_indices
    return out


def _reference(x, keep_indices, num_prefix_tokens):
    """Pure-JAX reference of the gather (for verification)."""
    prefix = x[:, :num_prefix_tokens]
    patches = x[:, num_prefix_tokens:]
    gathered = jnp.take_along_axis(patches, keep_indices[..., None], axis=1)
    return jnp.concatenate([prefix, gathered], axis=1)


if __name__ == "__main__":
    key = jax.random.PRNGKey(0)
    k_data, k_drop, k_data2, k_drop2 = jax.random.split(key, 4)

    # --- f32, 1 prefix token -------------------------------------------------
    B, N, D = 2, 16, 32          # 1 prefix token + 15 patch tokens, hidden 32
    prob = 0.5
    num_prefix_tokens = 1

    x = jax.random.normal(k_data, (B, N, D), dtype=jnp.float32)

    out, keep_indices = patch_dropout(
        x, k_drop,
        prob=prob,
        num_prefix_tokens=num_prefix_tokens,
        ordered=True,
        return_indices=True,
        training=True,
    )
    out = jax.block_until_ready(out)

    ref = _reference(x, keep_indices, num_prefix_tokens)
    assert out.shape == ref.shape, (out.shape, ref.shape)
    assert jnp.allclose(out, ref), "Pallas gather mismatch vs reference"

    # --- f32, num_prefix_tokens = 0 path ------------------------------------
    out0, idx0 = patch_dropout(
        x, k_drop, prob=prob, num_prefix_tokens=0, ordered=True,
        return_indices=True, training=True)
    out0 = jax.block_until_ready(out0)
    ref0 = _reference(x, idx0, 0)
    assert jnp.allclose(out0, ref0), "Pallas gather mismatch (no prefix)"

    # --- bf16, D multiple of 128, batch-blocked path -------------------------
    B2, N2, D2 = 4, 24, 256
    x2 = jax.random.normal(k_data2, (B2, N2, D2), dtype=jnp.bfloat16)
    out2, idx2 = patch_dropout(
        x2, k_drop2, prob=prob, num_prefix_tokens=1, ordered=False,
        return_indices=True, training=True)
    out2 = jax.block_until_ready(out2)
    ref2 = _reference(x2, idx2, 1)
    assert out2.shape == ref2.shape, (out2.shape, ref2.shape)
    assert jnp.allclose(out2.astype(jnp.float32), ref2.astype(jnp.float32)), \
        "Pallas gather mismatch (bf16, batch-blocked)"

    # --- eval mode / prob=0 path (identity) ----------------------------------
    out_eval = patch_dropout(x, k_drop, prob=prob, training=False)
    assert jnp.allclose(out_eval, x)

    print("KERNEL_OK")
</pallas_src>

<mosaic_0001>
module attributes {stable_mosaic.version = 11 : i64} {
  func.func @_patch_dropout_gather_kernel(%arg0: i32, %arg1: i32, %arg2: memref<2x8x1xi32, #tpu.memory_space<vmem>>, %arg3: memref<2x16x32xf32, #tpu.memory_space<vmem>>, %arg4: memref<2x8x32xf32, #tpu.memory_space<vmem>>, %arg5: memref<2x8x16xf32, #tpu.memory_space<vmem>>) attributes {dimension_semantics = [#tpu.dimension_semantics<parallel>, #tpu.dimension_semantics<arbitrary>], iteration_bounds = array<i64: 1, 1>, scalar_prefetch = 0 : i64, scratch_operands = 1 : i64, tpu.core_type = #tpu.core_type<tc>, window_params = [{transform_indices = @transform_0, window_bounds = array<i64: 2, 8, 1>}, {transform_indices = @transform_1, window_bounds = array<i64: 2, 16, 32>}, {transform_indices = @transform_2, window_bounds = array<i64: 2, 8, 32>}]} {
    %c0_i32 = arith.constant 0 : i32
    %0 = arith.cmpi eq, %arg1, %c0_i32 : i32
    %1 = arith.extui %0 : i1 to i32
    %c0_i32_0 = arith.constant 0 : i32
    %2 = arith.cmpi ne, %1, %c0_i32_0 : i32
    scf.if %2 {
      %7 = tpu.iota {dimensions = array<i32: 2>} : vector<2x8x16xi32>
      %c0_9 = arith.constant 0 : index
      %c0_10 = arith.constant 0 : index
      %c0_11 = arith.constant 0 : index
      %8 = vector.load %arg2[%c0_9, %c0_10, %c0_11] : memref<2x8x1xi32, #tpu.memory_space<vmem>>, vector<2x8x1xi32>
      %9 = vector.broadcast %8 : vector<2x8x1xi32> to vector<2x8x16xi32>
      %10 = arith.cmpi eq, %7, %9 : vector<2x8x16xi32>
      %11 = arith.extui %10 : vector<2x8x16xi1> to vector<2x8x16xi32>
      %12 = arith.sitofp %11 : vector<2x8x16xi32> to vector<2x8x16xf32>
      %c0_12 = arith.constant 0 : index
      %c0_13 = arith.constant 0 : index
      %c0_14 = arith.constant 0 : index
      %13 = vector.load %arg5[%c0_12, %c0_13, %c0_14] : memref<2x8x16xf32, #tpu.memory_space<vmem>>, vector<2x8x16xf32>
      tpu.vector_store %arg5[%c0_12, %c0_13, %c0_14], %12 {strides = array<i32>} : memref<2x8x16xf32, #tpu.memory_space<vmem>>, vector<2x8x16xf32>,
    } else {
    }
    %c0 = arith.constant 0 : index
    %c0_1 = arith.constant 0 : index
    %c0_2 = arith.constant 0 : index
    %3 = vector.load %arg5[%c0, %c0_1, %c0_2] : memref<2x8x16xf32, #tpu.memory_space<vmem>>, vector<2x8x16xf32>
    %c0_3 = arith.constant 0 : index
    %c0_4 = arith.constant 0 : index
    %c0_5 = arith.constant 0 : index
    %4 = vector.load %arg3[%c0_3, %c0_4, %c0_5] : memref<2x16x32xf32, #tpu.memory_space<vmem>>, vector<2x16x32xf32>
    "tpu.trace_start"() <{level = 10 : i32, message = "bqk,bkd->bqd"}> : () -> ()
    %cst = arith.constant dense<0.000000e+00> : vector<2x8x32xf32>
    %5 = tpu.matmul %3, %4, %cst {dimension_numbers = #tpu.dot_dimension_numbers<[2], [1], [1], [2], [0, 0, 0, 1, 1, 2], [0], [0]>} : vector<2x8x16xf32>, vector<2x16x32xf32>, vector<2x8x32xf32> -> vector<2x8x32xf32>
    "tpu.trace_stop"() : () -> ()
    %c0_6 = arith.constant 0 : index
    %c0_7 = arith.constant 0 : index
    %c0_8 = arith.constant 0 : index
    %6 = vector.load %arg4[%c0_6, %c0_7, %c0_8] : memref<2x8x32xf32, #tpu.memory_space<vmem>>, vector<2x8x32xf32>
    tpu.vector_store %arg4[%c0_6, %c0_7, %c0_8], %5 {strides = array<i32>} : memref<2x8x32xf32, #tpu.memory_space<vmem>>, vector<2x8x32xf32>,
    return
  }
  func.func @transform_0(%arg0: i32, %arg1: i32) -> (i32, i32, i32) {
    %c0_i32 = arith.constant 0 : i32
    %c0_i32_0 = arith.constant 0 : i32
    %c0_i32_1 = arith.constant 0 : i32
    return %arg0, %c0_i32, %c0_i32_0 : i32, i32, i32
  }
  func.func @transform_1(%arg0: i32, %arg1: i32) -> (i32, i32, i32) {
    %c0_i32 = arith.constant 0 : i32
    %c0_i32_0 = arith.constant 0 : i32
    return %arg0, %c0_i32, %arg1 : i32, i32, i32
  }
  func.func @transform_2(%arg0: i32, %arg1: i32) -> (i32, i32, i32) {
    %c0_i32 = arith.constant 0 : i32
    %c0_i32_0 = arith.constant 0 : i32
    return %arg0, %c0_i32, %arg1 : i32, i32, i32
  }
}

</mosaic_0001>

<bundles_post_ra>
// kernel: tpu_custom_call.1
= control target key start
LH: loop header
LB: loop body
LE: loop exit
PB: predicated region body
PF: predicated region fallthrough
CT: control target
= control target key end

     0   :  { %7 = vsyncpa [#allocation4], 0  ;;  %s368_s0 = inlined_call_operand.vmem [shape: s32[2,8,1], index: 0, kind: input, shape index: {}]   ;;  %s369_s1 = inlined_call_operand.hbm [shape: f32[2,16,32], index: 1, kind: input, shape index: {}]   ;;  %s370_s2 = inlined_call_operand.hbm [shape: f32[2,8,32], index: 2, kind: output, shape index: {}]  }
   0x1   :  { %8 = vsyncpa [#allocation5], 0  ;;  %s309_s9 = smov [#allocation3]   ;;  %s261_s13 = scalar_lea.hbm %s369_s1, 512 }
   0x2   :  { %s16_s10 = sshll.u32 %s309_s9, 4  ;;  %p262_p0 = scmp.ne.s32.totalorder %s369_s1, %s261_s13  ;;  %s17_s10 = int_to_ptr.vmem [resolvable:$true] %s16_s10 }
   0x3   :  { %p265_p1 = scmp.lt.u32.totalorder %s261_s13, %s369_s1 }
   0x5   :  { %p267_p2 = pnand %p265_p1, %p262_p0 }
   0x7   :  { %270 = shalt.err (!%p267_p2)
}
   0x8   :  { %s271_s18 = scalar_lea.vmem %s17_s10, 512  ;;  %p276_p4 = scmp.lt.s32.totalorder %s17_s10, %s17_s10 }
   0x9   :  { %p272_p3 = scmp.ne.s32.totalorder %s17_s10, %s271_s18  ;;  %p277_p5 = scmp.lt.s32.totalorder %s271_s18, %s271_s18 }
   0xb   :  { %p278_p6 = por %p277_p5, %p276_p4 }
   0xd   :  { %p279_p7 = pnand %p278_p6, %p272_p3 }
   0xf   :  { %282 = shalt.err (!%p279_p7)
}
  0x10   :  { %s310_s19 = smov 128   ;;  %s311_s20 = smov 8  }
  0x11   :  { %22 = dma.hbm_to_vmem [thread:$0]  %s369_s1, 512, %s17_s10, [#allocation4], %s310_s19, %s310_s19, %s311_s20  }
  0x12   :  { %305 = dma.done.wait [#allocation4], 512  }
  0x13   :  { %306 = vsyncadd [#allocation4], 4294966784  ;;  %v312_v0 = vmov 0   ;;  %v32_v1 = vld [vmem:[%s368_s0] sm:$0xff]  ;;  %v33_v2 = vld [vmem:[%s368_s0 + $0x8] sm:$0xff]  ;;  %v313_v6 = vmov 0.0|0.0   ;;  %v30_v11 = vlaneseq }
  0x14   :  { %260 = vset.pattern.permute.xlu0 %v312_v0  ;;  %v51_v3 = vld [vmem:[#allocation3] sm:$0xff]  ;;  %v52_v4 = vld [vmem:[#allocation3 + $0x8] sm:$0xff]  ;;  %246 = vmatprep.subr.bf16.mxu0 %v313_v6  ;;  %vm314_vm0 = vmmov 0   ;;  %v315_v7 = vmov 0.0   ;;  %v53_v8 = vld [vmem:[#allocation3 + $0x10] sm:$0xff]  ;;  %vm46_vm1 = vcmask 130048  }
  0x15   :  { %35 = vperm.xlu0 %260, %v32_v1   ;;  %v247_v5 = vpack.c.bf16 %v52_v4, %v51_v3  ;;  %236 = vmatprep.mubr.msk.f32.mxu0 %vm314_vm0, %v315_v7  ;;  %v54_v9 = vld [vmem:[#allocation3 + $0x18] sm:$0xff]  ;;  %v31_v12 = vand.u32 127, %v30_v11  ;;  %vm202_vm4 = vcmask 261120   ;;  %s316_s0 = smov [#allocation6]  }
  0x16   :  { %249 = vmatprep.subr.bf16.mxu1 %v313_v6  ;;  %243 = vmatprep.mubr.msk.f32.mxu1 %vm314_vm0, %v315_v7  ;;  %v250_v10 = vpack.c.bf16 %v54_v9, %v53_v8  ;;  %s210_s1 = sshll.u32 %s316_s0, 4  ;;  %s211_s1 = int_to_ptr.vmem [resolvable:$true] %s210_s1 }
  0x17   :  { %248 = vmatpush3.bf16.msra.mxu0 %v247_v5  ;;  %s283_s27 = scalar_lea.vmem %s211_s1, 256  ;;  %p288_p9 = scmp.lt.s32.totalorder %s211_s1, %s211_s1 }
  0x18   :  { %251 = vmatpush3.bf16.msra.mxu1 %v250_v10  ;;  %p284_p8 = scmp.ne.s32.totalorder %s211_s1, %s283_s27  ;;  %p289_p10 = scmp.lt.s32.totalorder %s283_s27, %s283_s27 }
  0x19   :  { %38 = vperm.xlu0 %260, %v33_v2  }
  0x1a   :  { %p290_p11 = por %p289_p10, %p288_p9 }
  0x1c   :  { %p291_p12 = pnand %p290_p11, %p284_p8 }
  0x94   :  { %v36_v13 = vpop.permute.xlu0 %35 }
  0x95   :  { %vm40_vm2 = vcmp.eq.s32.totalorder %v31_v12, %v36_v13 }
  0x96   :  { %v222_v14 = vsel %vm40_vm2, 1.0, %v315_v7 }
  0x97   :  { %47 = vst.msk [vmem:[#allocation2] sm:$0xff] %vm46_vm1, %v222_v14 }
  0x98   :  { %v39_v15 = vpop.permute.xlu0 %38 }
  0x99   :  { %vm41_vm3 = vcmp.eq.s32.totalorder %v31_v12, %v39_v15 }
  0x9a   :  { %v223_v16 = vsel %vm41_vm3, 1.0, %v315_v7 }
  0x9b   :  { %48 = vst.msk [vmem:[#allocation2 + $0x8] sm:$0xff] %vm46_vm1, %v223_v16 }
  0x9e   :  { %v49_v17 = vld [vmem:[#allocation2] sm:$0xff] }
  0x9f   :  { %237 = vmatmul.mubr.msk.f32.vlgmr.msra.gmra.mrb[0].mxu0 %vm46_vm1, %v49_v17 }
  0xa2   :  { %v50_v18 = vld [vmem:[#allocation2 + $0x8] sm:$0xff] }
  0xa3   :  { %244 = vmatmul.mubr.msk.f32.vlgmr.msra.gmra.mrb[0].mxu1 %vm46_vm1, %v50_v18 }
 0x172   :  { %v125_v19 = vpop.f32.mrb[0].mxu0 }
 0x173   :  { %203 = vst.msk [vmem:[#allocation6] sm:$0xff] %vm202_vm4, %v125_v19  ;;  %v238_v20 = vpop.f32.mrb[1].mxu0 }
 0x176   :  { %v198_v21 = vpop.f32.mrb[0].mxu1 }
 0x177   :  { %204 = vst.msk [vmem:[#allocation6 + $0x8] sm:$0xff] %vm202_vm4, %v198_v21  ;;  %v245_v22 = vpop.f32.mrb[1].mxu1 }
 0x178   :  { %294 = shalt.err (!%p291_p12)
}
 0x179   :  { %s295_s30 = scalar_lea.hbm %s370_s2, 256 }
 0x17a   :  { %p296_p13 = scmp.ne.s32.totalorder %s370_s2, %s295_s30  ;;  %p299_p0 = scmp.lt.u32.totalorder %s295_s30, %s370_s2 }
 0x17c   :  { %p301_p1 = pnand %p299_p0, %p296_p13 }
 0x17e   :  { %304 = shalt.err (!%p301_p1)
}
 0x17f   :  { %216 = dma.vmem_to_hbm [thread:$0]  %s211_s1, 256, %s370_s2, [#allocation5], %s310_s19, %s310_s19, %s311_s20  }
 0x180   :  { %307 = dma.done.wait [#allocation5], 256  }
 0x181   :  { %308 = vsyncadd [#allocation5], 4294967040 }
 0x182   :  { %220 = vsyncpa [#allocation4], 1 }
 0x183   :  { %221 = vsyncpa [#allocation5], 1 }

</bundles_post_ra>
